<compile_context>
chip_gen: v5e
topology: v5e:2x2
jax: 0.10.0
libtpu: 0.0.40
codegen_flags: <defaults>
</compile_context>

<pallas_src>
import functools

import jax
import jax.numpy as jnp
from jax.experimental import pallas as pl
from jax.experimental.pallas import tpu as pltpu


def _conv_bn_act_kernel(w_ref, bias_ref, x_ref, o_ref, *, k, wp, n_out):
    # w_ref:    (k*k, TCout, Cin)  compute_dtype, BN scale pre-folded per Cout row
    # bias_ref: (TCout, 1)         f32  (beta - mean * scale)
    # x_ref:    (1, Cin, Hp*Wp)    compute_dtype, zero-padded input, rows flattened
    # o_ref:    (1, TCout, n_out)  n_out = H*Wp (right-pad columns hold garbage,
    #                              cropped by the wrapper)
    acc = None
    for kh in range(k):
        for kw in range(k):
            off = kh * wp + kw                                  # static flat offset
            xtap = x_ref[0, :, pl.ds(off, n_out)]               # (Cin, n_out)
            contrib = jnp.dot(w_ref[kh * k + kw], xtap,
                              preferred_element_type=jnp.float32)
            acc = contrib if acc is None else acc + contrib     # (TCout, n_out) f32
    y = acc + bias_ref[...]                                     # BN bias (scale folded)
    y = y * pl.reciprocal(1.0 + jnp.exp(-y), approx=True)       # SiLU on the EUP
    o_ref[0] = y.astype(o_ref.dtype)


@functools.partial(jax.jit, static_argnames=("stride", "padding", "eps",
                                              "out_dtype", "compute_dtype"))
def conv_bn_act(x, w, gamma, beta, running_mean, running_var, *,
                stride=1, padding=1, eps=1e-5,
                out_dtype=jnp.bfloat16, compute_dtype=jnp.bfloat16):
    """x: (B, Cin, H, W).  w: (Cout, Cin, k, k) (PyTorch OIHW, bias=False).
    gamma/beta/running_mean/running_var: (Cout,) inference BatchNorm params."""
    B, Cin, H, W = x.shape
    Cout, Cin2, KH, KW = w.shape
    assert Cin2 == Cin and KH == KW
    k = KH
    assert k % 2 == 1 and stride == 1 and padding == k // 2, \
        "TODO(synk): only stride=1 'same' convolutions are supported"
    p = padding
    f32 = jnp.float32

    # --- fold BatchNorm (inference) into weight scale + bias column -----------
    inv_std = jax.lax.rsqrt(running_var.astype(f32) + eps)
    scale = gamma.astype(f32) * inv_std                               # (Cout,)
    bias = (beta.astype(f32) - running_mean.astype(f32) * scale).reshape(Cout, 1)
    wf = w.astype(f32) * scale[:, None, None, None]                   # fold in f32
    w_taps = jnp.transpose(wf, (2, 3, 0, 1)).reshape(k * k, Cout, Cin)
    w_taps = w_taps.astype(compute_dtype)                             # bf16 MXU operand

    # --- zero-pad the input once (no im2col in HBM), flatten rows -------------
    # p rows on top, p+1 rows on the bottom (1 extra row of slack so the flat
    # tap offsets never read out of bounds), p columns on each side.
    Hp, Wp = H + 2 * p + 1, W + 2 * p
    xp = jnp.pad(x, ((0, 0), (0, 0), (p, p + 1), (p, p))).astype(compute_dtype)
    xp = xp.reshape(B, Cin, Hp * Wp)
    n_out = H * Wp                                                    # flat output length

    # --- Cout tiling -----------------------------------------------------------
    if Cout % 256 == 0:
        tc = 256
    elif Cout % 128 == 0:
        tc = 128
    else:
        tc = Cout
    n_cout = Cout // tc

    # --- VMEM budget (block bytes x buffer count + headroom) -------------------
    cbytes = jnp.dtype(compute_dtype).itemsize
    obytes = jnp.dtype(out_dtype).itemsize
    in_block = Cin * Hp * Wp * cbytes
    w_block = k * k * tc * Cin * cbytes
    out_block = tc * n_out * obytes
    acc_block = tc * n_out * 4
    est = 2 * (in_block + w_block + tc * 4 + out_block) + 4 * acc_block + (2 << 20)
    vmem_limit = int(min(max(est, 4 << 20), 64 << 20))

    cost = pl.CostEstimate(
        flops=int(2 * B * Cout * Cin * k * k * H * W + 4 * B * Cout * H * W),
        transcendentals=int(B * Cout * H * W),
        bytes_accessed=int(B * Cin * Hp * Wp * cbytes
                           + B * Cout * n_out * obytes
                           + k * k * Cout * Cin * cbytes + Cout * 4),
    )

    out_flat = pl.pallas_call(
        functools.partial(_conv_bn_act_kernel, k=k, wp=Wp, n_out=n_out),
        out_shape=jax.ShapeDtypeStruct((B, Cout, n_out), out_dtype),
        grid_spec=pltpu.PrefetchScalarGridSpec(
            num_scalar_prefetch=0,
            grid=(B, n_cout),
            in_specs=[
                pl.BlockSpec((k * k, tc, Cin), lambda b, c: (0, c, 0)),   # folded weights
                pl.BlockSpec((tc, 1), lambda b, c: (c, 0)),               # BN bias column
                pl.BlockSpec((1, Cin, Hp * Wp), lambda b, c: (b, 0, 0)),  # padded image
            ],
            out_specs=pl.BlockSpec((1, tc, n_out), lambda b, c: (b, c, 0)),
        ),
        compiler_params=pltpu.CompilerParams(
            dimension_semantics=("parallel", "parallel"),
            vmem_limit_bytes=vmem_limit),
        cost_estimate=cost,
    )(w_taps, bias, xp)

    # Crop the per-row right padding and restore NCHW (small: Wp = W + k - 1).
    return out_flat.reshape(B, Cout, H, Wp)[:, :, :, :W]


def reference_conv_bn_act(x, w, gamma, beta, mean, var, *, stride=1, padding=1, eps=1e-5):
    # Pure-JAX reference mirroring the PyTorch forward (eval-mode BatchNorm).
    y = jax.lax.conv_general_dilated(
        x, w, window_strides=(stride, stride),
        padding=((padding, padding), (padding, padding)),
        dimension_numbers=("NCHW", "OIHW", "NCHW"),
        precision=jax.lax.Precision.HIGHEST)
    scale = gamma / jnp.sqrt(var + eps)
    bias = beta - mean * scale
    y = y * scale[None, :, None, None] + bias[None, :, None, None]
    return y * jax.nn.sigmoid(y)                                      # SiLU


if __name__ == "__main__":
    B, Cin, Cout, H, W = 2, 4, 8, 16, 16
    eps = 1e-5

    key = jax.random.PRNGKey(0)
    kx, kw_, kg, kb, km = jax.random.split(key, 5)

    # x / w rounded to the bf16 grid so the bf16 MXU products are exact; BN scale
    # chosen as a power of two with var + eps == 1 so folding it into the bf16
    # weights is also exact -> the only kernel/reference deltas are f32 accumulation
    # order, the approximate reciprocal in SiLU and the bf16 output cast.
    x = jax.random.normal(kx, (B, Cin, H, W), jnp.float32)
    x = x.astype(jnp.bfloat16).astype(jnp.float32)
    w = 0.25 * jax.random.normal(kw_, (Cout, Cin, 3, 3), jnp.float32)
    w = w.astype(jnp.bfloat16).astype(jnp.float32)

    gamma = 2.0 ** jax.random.randint(kg, (Cout,), -1, 2)             # {0.5, 1, 2}
    gamma = gamma.astype(jnp.float32)
    running_var = jnp.full((Cout,), 1.0 - eps, jnp.float32)
    beta = 0.1 * jax.random.normal(kb, (Cout,), jnp.float32)
    running_mean = 0.1 * jax.random.normal(km, (Cout,), jnp.float32)

    out = jax.block_until_ready(
        conv_bn_act(x, w, gamma, beta, running_mean, running_var, eps=eps))
    ref = reference_conv_bn_act(x, w, gamma, beta, running_mean, running_var, eps=eps)

    assert out.shape == (B, Cout, H, W)
    assert out.dtype == jnp.bfloat16
    out32 = out.astype(jnp.float32)
    max_err = float(jnp.max(jnp.abs(out32 - ref)))
    assert jnp.allclose(out32, ref, atol=1e-2, rtol=1e-2), \
        f"mismatch vs reference (max abs err {max_err})"
    print("KERNEL_OK")
</pallas_src>

<mosaic_0001>
module attributes {stable_mosaic.version = 11 : i64} {
  func.func @_conv_bn_act_kernel(%arg0: i32, %arg1: i32, %arg2: memref<9x8x4xbf16, #tpu.memory_space<vmem>>, %arg3: memref<8x1xf32, #tpu.memory_space<vmem>>, %arg4: memref<1x4x342xbf16, #tpu.memory_space<vmem>>, %arg5: memref<1x8x288xbf16, #tpu.memory_space<vmem>>) attributes {dimension_semantics = [#tpu.dimension_semantics<parallel>, #tpu.dimension_semantics<parallel>], iteration_bounds = array<i64: 2, 1>, scalar_prefetch = 0 : i64, scratch_operands = 0 : i64, tpu.core_type = #tpu.core_type<tc>, window_params = [{transform_indices = @transform_0, window_bounds = array<i64: 9, 8, 4>}, {transform_indices = @transform_1, window_bounds = array<i64: 8, 1>}, {transform_indices = @transform_2, window_bounds = array<i64: 1, 4, 342>}, {transform_indices = @transform_3, window_bounds = array<i64: 1, 8, 288>}]} {
    %c0 = arith.constant 0 : index
    %c0_0 = arith.constant 0 : index
    %c0_1 = arith.constant 0 : index
    %0 = vector.load %arg4[%c0, %c0_0, %c0_1] : memref<1x4x342xbf16, #tpu.memory_space<vmem>>, vector<1x4x288xbf16>
    %1 = vector.shape_cast %0 : vector<1x4x288xbf16> to vector<4x288xbf16>
    %c0_2 = arith.constant 0 : index
    %c0_3 = arith.constant 0 : index
    %c0_4 = arith.constant 0 : index
    %2 = vector.load %arg2[%c0_2, %c0_3, %c0_4] : memref<9x8x4xbf16, #tpu.memory_space<vmem>>, vector<1x8x4xbf16>
    %3 = vector.shape_cast %2 : vector<1x8x4xbf16> to vector<8x4xbf16>
    %cst = arith.constant dense<0.000000e+00> : vector<8x288xf32>
    %4 = tpu.matmul %3, %1, %cst {dimension_numbers = #tpu.dot_dimension_numbers<[1], [0], [0], [1], [0, 0, 1, 1], [], []>} : vector<8x4xbf16>, vector<4x288xbf16>, vector<8x288xf32> -> vector<8x288xf32>
    %c0_5 = arith.constant 0 : index
    %c0_6 = arith.constant 0 : index
    %c1 = arith.constant 1 : index
    %5 = vector.load %arg4[%c0_5, %c0_6, %c1] : memref<1x4x342xbf16, #tpu.memory_space<vmem>>, vector<1x4x288xbf16>
    %6 = vector.shape_cast %5 : vector<1x4x288xbf16> to vector<4x288xbf16>
    %c1_7 = arith.constant 1 : index
    %c0_8 = arith.constant 0 : index
    %c0_9 = arith.constant 0 : index
    %7 = vector.load %arg2[%c1_7, %c0_8, %c0_9] : memref<9x8x4xbf16, #tpu.memory_space<vmem>>, vector<1x8x4xbf16>
    %8 = vector.shape_cast %7 : vector<1x8x4xbf16> to vector<8x4xbf16>
    %cst_10 = arith.constant dense<0.000000e+00> : vector<8x288xf32>
    %9 = tpu.matmul %8, %6, %cst_10 {dimension_numbers = #tpu.dot_dimension_numbers<[1], [0], [0], [1], [0, 0, 1, 1], [], []>} : vector<8x4xbf16>, vector<4x288xbf16>, vector<8x288xf32> -> vector<8x288xf32>
    %10 = arith.addf %4, %9 : vector<8x288xf32>
    %c0_11 = arith.constant 0 : index
    %c0_12 = arith.constant 0 : index
    %c2 = arith.constant 2 : index
    %11 = vector.load %arg4[%c0_11, %c0_12, %c2] : memref<1x4x342xbf16, #tpu.memory_space<vmem>>, vector<1x4x288xbf16>
    %12 = vector.shape_cast %11 : vector<1x4x288xbf16> to vector<4x288xbf16>
    %c2_13 = arith.constant 2 : index
    %c0_14 = arith.constant 0 : index
    %c0_15 = arith.constant 0 : index
    %13 = vector.load %arg2[%c2_13, %c0_14, %c0_15] : memref<9x8x4xbf16, #tpu.memory_space<vmem>>, vector<1x8x4xbf16>
    %14 = vector.shape_cast %13 : vector<1x8x4xbf16> to vector<8x4xbf16>
    %cst_16 = arith.constant dense<0.000000e+00> : vector<8x288xf32>
    %15 = tpu.matmul %14, %12, %cst_16 {dimension_numbers = #tpu.dot_dimension_numbers<[1], [0], [0], [1], [0, 0, 1, 1], [], []>} : vector<8x4xbf16>, vector<4x288xbf16>, vector<8x288xf32> -> vector<8x288xf32>
    %16 = arith.addf %10, %15 : vector<8x288xf32>
    %c0_17 = arith.constant 0 : index
    %c0_18 = arith.constant 0 : index
    %c18 = arith.constant 18 : index
    %17 = vector.load %arg4[%c0_17, %c0_18, %c18] : memref<1x4x342xbf16, #tpu.memory_space<vmem>>, vector<1x4x288xbf16>
    %18 = vector.shape_cast %17 : vector<1x4x288xbf16> to vector<4x288xbf16>
    %c3 = arith.constant 3 : index
    %c0_19 = arith.constant 0 : index
    %c0_20 = arith.constant 0 : index
    %19 = vector.load %arg2[%c3, %c0_19, %c0_20] : memref<9x8x4xbf16, #tpu.memory_space<vmem>>, vector<1x8x4xbf16>
    %20 = vector.shape_cast %19 : vector<1x8x4xbf16> to vector<8x4xbf16>
    %cst_21 = arith.constant dense<0.000000e+00> : vector<8x288xf32>
    %21 = tpu.matmul %20, %18, %cst_21 {dimension_numbers = #tpu.dot_dimension_numbers<[1], [0], [0], [1], [0, 0, 1, 1], [], []>} : vector<8x4xbf16>, vector<4x288xbf16>, vector<8x288xf32> -> vector<8x288xf32>
    %22 = arith.addf %16, %21 : vector<8x288xf32>
    %c0_22 = arith.constant 0 : index
    %c0_23 = arith.constant 0 : index
    %c19 = arith.constant 19 : index
    %23 = vector.load %arg4[%c0_22, %c0_23, %c19] : memref<1x4x342xbf16, #tpu.memory_space<vmem>>, vector<1x4x288xbf16>
    %24 = vector.shape_cast %23 : vector<1x4x288xbf16> to vector<4x288xbf16>
    %c4 = arith.constant 4 : index
    %c0_24 = arith.constant 0 : index
    %c0_25 = arith.constant 0 : index
    %25 = vector.load %arg2[%c4, %c0_24, %c0_25] : memref<9x8x4xbf16, #tpu.memory_space<vmem>>, vector<1x8x4xbf16>
    %26 = vector.shape_cast %25 : vector<1x8x4xbf16> to vector<8x4xbf16>
    %cst_26 = arith.constant dense<0.000000e+00> : vector<8x288xf32>
    %27 = tpu.matmul %26, %24, %cst_26 {dimension_numbers = #tpu.dot_dimension_numbers<[1], [0], [0], [1], [0, 0, 1, 1], [], []>} : vector<8x4xbf16>, vector<4x288xbf16>, vector<8x288xf32> -> vector<8x288xf32>
    %28 = arith.addf %22, %27 : vector<8x288xf32>
    %c0_27 = arith.constant 0 : index
    %c0_28 = arith.constant 0 : index
    %c20 = arith.constant 20 : index
    %29 = vector.load %arg4[%c0_27, %c0_28, %c20] : memref<1x4x342xbf16, #tpu.memory_space<vmem>>, vector<1x4x288xbf16>
    %30 = vector.shape_cast %29 : vector<1x4x288xbf16> to vector<4x288xbf16>
    %c5 = arith.constant 5 : index
    %c0_29 = arith.constant 0 : index
    %c0_30 = arith.constant 0 : index
    %31 = vector.load %arg2[%c5, %c0_29, %c0_30] : memref<9x8x4xbf16, #tpu.memory_space<vmem>>, vector<1x8x4xbf16>
    %32 = vector.shape_cast %31 : vector<1x8x4xbf16> to vector<8x4xbf16>
    %cst_31 = arith.constant dense<0.000000e+00> : vector<8x288xf32>
    %33 = tpu.matmul %32, %30, %cst_31 {dimension_numbers = #tpu.dot_dimension_numbers<[1], [0], [0], [1], [0, 0, 1, 1], [], []>} : vector<8x4xbf16>, vector<4x288xbf16>, vector<8x288xf32> -> vector<8x288xf32>
    %34 = arith.addf %28, %33 : vector<8x288xf32>
    %c0_32 = arith.constant 0 : index
    %c0_33 = arith.constant 0 : index
    %c36 = arith.constant 36 : index
    %35 = vector.load %arg4[%c0_32, %c0_33, %c36] : memref<1x4x342xbf16, #tpu.memory_space<vmem>>, vector<1x4x288xbf16>
    %36 = vector.shape_cast %35 : vector<1x4x288xbf16> to vector<4x288xbf16>
    %c6 = arith.constant 6 : index
    %c0_34 = arith.constant 0 : index
    %c0_35 = arith.constant 0 : index
    %37 = vector.load %arg2[%c6, %c0_34, %c0_35] : memref<9x8x4xbf16, #tpu.memory_space<vmem>>, vector<1x8x4xbf16>
    %38 = vector.shape_cast %37 : vector<1x8x4xbf16> to vector<8x4xbf16>
    %cst_36 = arith.constant dense<0.000000e+00> : vector<8x288xf32>
    %39 = tpu.matmul %38, %36, %cst_36 {dimension_numbers = #tpu.dot_dimension_numbers<[1], [0], [0], [1], [0, 0, 1, 1], [], []>} : vector<8x4xbf16>, vector<4x288xbf16>, vector<8x288xf32> -> vector<8x288xf32>
    %40 = arith.addf %34, %39 : vector<8x288xf32>
    %c0_37 = arith.constant 0 : index
    %c0_38 = arith.constant 0 : index
    %c37 = arith.constant 37 : index
    %41 = vector.load %arg4[%c0_37, %c0_38, %c37] : memref<1x4x342xbf16, #tpu.memory_space<vmem>>, vector<1x4x288xbf16>
    %42 = vector.shape_cast %41 : vector<1x4x288xbf16> to vector<4x288xbf16>
    %c7 = arith.constant 7 : index
    %c0_39 = arith.constant 0 : index
    %c0_40 = arith.constant 0 : index
    %43 = vector.load %arg2[%c7, %c0_39, %c0_40] : memref<9x8x4xbf16, #tpu.memory_space<vmem>>, vector<1x8x4xbf16>
    %44 = vector.shape_cast %43 : vector<1x8x4xbf16> to vector<8x4xbf16>
    %cst_41 = arith.constant dense<0.000000e+00> : vector<8x288xf32>
    %45 = tpu.matmul %44, %42, %cst_41 {dimension_numbers = #tpu.dot_dimension_numbers<[1], [0], [0], [1], [0, 0, 1, 1], [], []>} : vector<8x4xbf16>, vector<4x288xbf16>, vector<8x288xf32> -> vector<8x288xf32>
    %46 = arith.addf %40, %45 : vector<8x288xf32>
    %c0_42 = arith.constant 0 : index
    %c0_43 = arith.constant 0 : index
    %c38 = arith.constant 38 : index
    %47 = vector.load %arg4[%c0_42, %c0_43, %c38] : memref<1x4x342xbf16, #tpu.memory_space<vmem>>, vector<1x4x288xbf16>
    %48 = vector.shape_cast %47 : vector<1x4x288xbf16> to vector<4x288xbf16>
    %c8 = arith.constant 8 : index
    %c0_44 = arith.constant 0 : index
    %c0_45 = arith.constant 0 : index
    %49 = vector.load %arg2[%c8, %c0_44, %c0_45] : memref<9x8x4xbf16, #tpu.memory_space<vmem>>, vector<1x8x4xbf16>
    %50 = vector.shape_cast %49 : vector<1x8x4xbf16> to vector<8x4xbf16>
    %cst_46 = arith.constant dense<0.000000e+00> : vector<8x288xf32>
    %51 = tpu.matmul %50, %48, %cst_46 {dimension_numbers = #tpu.dot_dimension_numbers<[1], [0], [0], [1], [0, 0, 1, 1], [], []>} : vector<8x4xbf16>, vector<4x288xbf16>, vector<8x288xf32> -> vector<8x288xf32>
    %52 = arith.addf %46, %51 : vector<8x288xf32>
    %c0_47 = arith.constant 0 : index
    %c0_48 = arith.constant 0 : index
    %53 = vector.load %arg3[%c0_47, %c0_48] : memref<8x1xf32, #tpu.memory_space<vmem>>, vector<8x1xf32>
    %54 = vector.broadcast %53 : vector<8x1xf32> to vector<8x288xf32>
    %55 = arith.addf %52, %54 : vector<8x288xf32>
    %cst_49 = arith.constant 0.000000e+00 : f32
    %56 = vector.broadcast %cst_49 : f32 to vector<8x288xf32>
    %57 = arith.subf %56, %55 : vector<8x288xf32>
    %58 = math.exp %57 : vector<8x288xf32>
    %cst_50 = arith.constant 1.000000e+00 : f32
    %59 = vector.broadcast %cst_50 : f32 to vector<8x288xf32>
    %60 = arith.addf %59, %58 : vector<8x288xf32>
    %61 = tpu.reciprocal %60 {approx = true} : vector<8x288xf32> -> vector<8x288xf32>
    %62 = arith.mulf %55, %61 : vector<8x288xf32>
    %63 = arith.truncf %62 : vector<8x288xf32> to vector<8x288xbf16>
    %c0_51 = arith.constant 0 : index
    %c0_52 = arith.constant 0 : index
    %c0_53 = arith.constant 0 : index
    %64 = vector.load %arg5[%c0_51, %c0_52, %c0_53] : memref<1x8x288xbf16, #tpu.memory_space<vmem>>, vector<1x8x288xbf16>
    %65 = vector.shape_cast %64 : vector<1x8x288xbf16> to vector<8x288xbf16>
    %66 = vector.shape_cast %63 : vector<8x288xbf16> to vector<1x8x288xbf16>
    tpu.vector_store %arg5[%c0_51, %c0_52, %c0_53], %66 {strides = array<i32>} : memref<1x8x288xbf16, #tpu.memory_space<vmem>>, vector<1x8x288xbf16>,
    return
  }
  func.func @transform_0(%arg0: i32, %arg1: i32) -> (i32, i32, i32) {
    %c0_i32 = arith.constant 0 : i32
    %c0_i32_0 = arith.constant 0 : i32
    %c0_i32_1 = arith.constant 0 : i32
    return %c0_i32, %arg1, %c0_i32_0 : i32, i32, i32
  }
  func.func @transform_1(%arg0: i32, %arg1: i32) -> (i32, i32) {
    %c0_i32 = arith.constant 0 : i32
    %c0_i32_0 = arith.constant 0 : i32
    return %arg1, %c0_i32 : i32, i32
  }
  func.func @transform_2(%arg0: i32, %arg1: i32) -> (i32, i32, i32) {
    %c0_i32 = arith.constant 0 : i32
    %c0_i32_0 = arith.constant 0 : i32
    %c0_i32_1 = arith.constant 0 : i32
    return %arg0, %c0_i32, %c0_i32_0 : i32, i32, i32
  }
  func.func @transform_3(%arg0: i32, %arg1: i32) -> (i32, i32, i32) {
    %c0_i32 = arith.constant 0 : i32
    %c0_i32_0 = arith.constant 0 : i32
    return %arg0, %arg1, %c0_i32 : i32, i32, i32
  }
}

</mosaic_0001>

<bundles_post_ra>
// kernel: conv_bn_act.1
= control target key start
LH: loop header
LB: loop body
LE: loop exit
PB: predicated region body
PF: predicated region fallthrough
CT: control target
= control target key end

     0   :  { %s1165_s12 = smov 0   ;;  %s1167_s13 = smov 0   ;;  %s1309_s0 = inlined_call_operand.vmem [shape: bf16[9,8,4], index: 0, kind: input, shape index: {}]   ;;  %s1310_s1 = inlined_call_operand.vmem [shape: f32[8,1], index: 1, kind: input, shape index: {}]   ;;  %s1311_s2 = inlined_call_operand.vmem [shape: bf16[2,4,342], index: 2, kind: input, shape index: {}]   ;;  %s1312_s3 = inlined_call_operand.vmem [shape: bf16[2,8,288], index: 3, kind: output, shape index: {}]  }
   0x1   :  { %s1169_s14 = smov 0  }
   0x2 LB: > { %s25_s15 = sadd.s32 1, %s1130_s13  ;;  %p1024_p0 = scmp.ge.s32.totalorder %s1134_s14, 1  ;;  %s1134_s14 = sphi %s1169_s14, %s13_s14   ;;  %s1130_s13 = sphi %s1167_s13, %s1314_s13   ;;  %s1126_s12 = sphi %s1165_s12, %s1313_s12  }
   0x3   : > { %p27_p1 = scmp.ge.s32.totalorder %s25_s15, 2  ;;  %p169_p2 = scmp.lt.s32.totalorder %s1134_s14, 3 }
   0x5   : > { %s1316_s15 = smov (%p27_p1, %s25_s15), 0  ;;  %p170_p3 = pnand %p1024_p0, %p169_p2 }
   0x6   : > { %p213_p4 = scmp.lt.s32.totalorder (!%p170_p3), %s1126_s12, 1  ;;  %s1136_s20 = smov (!%p170_p3), 127  }
   0x7   : > { %173 = sbr.rel (%p170_p3) target bundleno = 405 (0x195), region = 32  ;;  %s1137_s21 = smov (!%p170_p3), 126  }
   0x8   : > { %s1138_s22 = smov (!%p170_p3), 110   ;;  %s1139_s23 = smov (!%p170_p3), 109  }
   0x9   : > { %s1140_s24 = smov (!%p170_p3), 108   ;;  %s1141_s25 = smov (!%p170_p3), 92  }
   0xa   : > { %s1142_s26 = smov (!%p170_p3), 91   ;;  %s1143_s27 = smov (!%p170_p3), 90  }
   0xc   : > { %s1318_s12 = smov (!%p213_p4, %s1126_s12), 1  ;;  %vm253_vm0 = vcmask 1041408   ;;  %v229_v36 = vld [vmem:[%s1309_s0] sm:$0xf]  ;;  %vm249_vm1 = vcmask 31744   ;;  %vm246_vm2 = vcmask 1039360  }
   0xd   : > { %s1064_s16 = smul.u32 6, %s1318_s12  ;;  %v1027_v44 = vld [vmem:[%s1309_s0 + $0x4] sm:$0xf]  ;;  %vm371_vm3 = vcmask 1031168   ;;  %v1034_v48 = vld [vmem:[%s1309_s0 + $0x8] sm:$0xf] }
   0xe   : > { %vm445_vm4 = vcmask 900096   ;;  %vm519_vm5 = vcmask 891904   ;;  %vm593_vm6 = vcmask 883712   ;;  %vm667_vm7 = vcmask 752640  }
   0xf   : > { %s1189_s19 = scalar_lea.vmem %s1311_s2, %s1064_s16  ;;  %vm741_vm8 = vcmask 744448   ;;  %vm815_vm9 = vcmask 736256   ;;  %vm902_vm10 = vcmask 257024  }
  0x10   : > { %v228_v0 = vld [vmem:[%s1189_s19] sm:$0x3f] }
  0x11   : > { %233 = vst [vmem:[#allocation1] ss:$4 sm:$0xff] %v228_v0  ;;  %v354_v4 = vld [vmem:[%s1189_s19] sm:$0x3f] }
  0x12   : > { %v428_v8 = vld [vmem:[%s1189_s19] sm:$0x3f] }
  0x13   : > { %v502_v12 = vld [vmem:[%s1189_s19] sm:$0x3f] }
  0x14   : > { %v576_v16 = vld [vmem:[%s1189_s19] sm:$0x3f] }
  0x15   : > { %v650_v20 = vld [vmem:[%s1189_s19] sm:$0x3f] }
  0x16   : > { %v724_v24 = vld [vmem:[%s1189_s19] sm:$0x3f] }
  0x17   : > { %v798_v28 = vld [vmem:[%s1189_s19] sm:$0x3f] }
  0x18   : > { %v238_v1 = vld.sshfl [vmem:[#allocation1 + $0x10] sm:$0xff pattern:$0x73625140]  ;;  %v236_v2 = vld.sshfl [vmem:[#allocation1 + $0x8] sm:$0xff pattern:$0x73625140] }
  0x19   : > { %244 = vrot.lane.b32.xlu0 %v238_v1, %s1136_s20  ;;  %242 = vrot.lane.b32.xlu1 %v236_v2, %s1136_s20  ;;  %v234_v3 = vld.sshfl [vmem:[#allocation1] sm:$0xff pattern:$0x73625140]  ;;  %v1038_v1 = vld [vmem:[%s1309_s0 + $0xc] sm:$0xf] }
  0x1a   : > { %302 = vst [vmem:[#allocation1] ss:$4 sm:$0xff] %v228_v0 }
  0x21   : > { %240 = vrot.lane.b32.xlu0 %v234_v3, %s1136_s20  ;;  %v1193_v5 = vld.sshfl [vmem:[#allocation1] sm:$0xff pattern:$0x73625140]  ;;  %v1195_v6 = vld.sshfl [vmem:[#allocation1 + $0x8] sm:$0xff pattern:$0x73625140] }
  0x22   : > { %v1197_v7 = vld.sshfl [vmem:[#allocation1 + $0x10] sm:$0xff pattern:$0x73625140]  ;;  %v309_v35 = vsel %vm253_vm0, %v1193_v5, 0  ;;  %v311_v51 = vsel %vm253_vm0, %v1195_v6, 0 }
  0x23   : > { %358 = vst [vmem:[#allocation1] ss:$4 sm:$0xff] %v354_v4  ;;  %322 = vmatpush.bf16.msra.mxu3 %v309_v35  ;;  %v313_v42 = vsel %vm253_vm0, %v1197_v7, 0 }
  0x26   : > { %1031 = vmatmul.msk.bf16.vlgmr.msra.gmra.mxu3 %vm249_vm1, %v229_v36 }
  0x2a   : > { %v359_v9 = vld.sshfl [vmem:[#allocation1] sm:$0xff pattern:$0x73625140]  ;;  %v361_v10 = vld.sshfl [vmem:[#allocation1 + $0x8] sm:$0xff pattern:$0x73625140] }
  0x2b   : > { %365 = vrot.lane.b32.xlu1 %v359_v9, %s1137_s21  ;;  %367 = vrot.lane.b32.xlu2 %v361_v10, %s1137_s21  ;;  %v363_v11 = vld.sshfl [vmem:[#allocation1 + $0x10] sm:$0xff pattern:$0x73625140] }
  0x2c   : > { %432 = vst [vmem:[#allocation1] ss:$4 sm:$0xff] %v428_v8 }
  0x33   : > { %v437_v13 = vld.sshfl [vmem:[#allocation1 + $0x10] sm:$0xff pattern:$0x73625140]  ;;  %v433_v14 = vld.sshfl [vmem:[#allocation1] sm:$0xff pattern:$0x73625140]  ;;  %369 = vrot.lane.b32.xlu2 %v363_v11, %s1137_s21 }
  0x34   : > { %443 = vrot.lane.b32.xlu1 %v437_v13, %s1138_s22  ;;  %v435_v15 = vld.sshfl [vmem:[#allocation1 + $0x8] sm:$0xff pattern:$0x73625140] }
  0x35   : > { %441 = vrot.lane.b32.xlu0 %v435_v15, %s1138_s22  ;;  %506 = vst [vmem:[#allocation1] ss:$4 sm:$0xff] %v502_v12  ;;  %v1046_v15 = vld [vmem:[%s1309_s0 + $0x14] sm:$0xf] }
  0x3b   : > { %439 = vrot.lane.b32.xlu2 %v433_v14, %s1138_s22 }
  0x3c   : > { %v511_v17 = vld.sshfl [vmem:[#allocation1 + $0x10] sm:$0xff pattern:$0x73625140]  ;;  %v509_v18 = vld.sshfl [vmem:[#allocation1 + $0x8] sm:$0xff pattern:$0x73625140] }
  0x3d   : > { %517 = vrot.lane.b32.xlu0 %v511_v17, %s1139_s23  ;;  %v507_v19 = vld.sshfl [vmem:[#allocation1] sm:$0xff pattern:$0x73625140] }
  0x3e   : > { %513 = vrot.lane.b32.xlu1 %v507_v19, %s1139_s23  ;;  %580 = vst [vmem:[#allocation1] ss:$4 sm:$0xff] %v576_v16  ;;  %v1042_v16 = vld [vmem:[%s1309_s0 + $0x10] sm:$0xf] }
  0x43   : > { %515 = vrot.lane.b32.xlu2 %v509_v18, %s1139_s23 }
  0x45   : > { %v583_v21 = vld.sshfl [vmem:[#allocation1 + $0x8] sm:$0xff pattern:$0x73625140]  ;;  %v581_v22 = vld.sshfl [vmem:[#allocation1] sm:$0xff pattern:$0x73625140] }
  0x46   : > { %589 = vrot.lane.b32.xlu1 %v583_v21, %s1140_s24  ;;  %587 = vrot.lane.b32.xlu0 %v581_v22, %s1140_s24  ;;  %v585_v23 = vld.sshfl [vmem:[#allocation1 + $0x10] sm:$0xff pattern:$0x73625140] }
  0x47   : > { %654 = vst [vmem:[#allocation1] ss:$4 sm:$0xff] %v650_v20 }
  0x4e   : > { %591 = vrot.lane.b32.xlu1 %v585_v23, %s1140_s24  ;;  %v659_v25 = vld.sshfl [vmem:[#allocation1 + $0x10] sm:$0xff pattern:$0x73625140]  ;;  %v657_v26 = vld.sshfl [vmem:[#allocation1 + $0x8] sm:$0xff pattern:$0x73625140] }
  0x4f   : > { %663 = vrot.lane.b32.xlu0 %v657_v26, %s1141_s25  ;;  %v655_v27 = vld.sshfl [vmem:[#allocation1] sm:$0xff pattern:$0x73625140] }
  0x50   : > { %661 = vrot.lane.b32.xlu2 %v655_v27, %s1141_s25  ;;  %728 = vst [vmem:[#allocation1] ss:$4 sm:$0xff] %v724_v24 }
  0x57   : > { %v729_v29 = vld.sshfl [vmem:[#allocation1] sm:$0xff pattern:$0x73625140]  ;;  %v733_v30 = vld.sshfl [vmem:[#allocation1 + $0x10] sm:$0xff pattern:$0x73625140] }
  0x58   : > { %739 = vrot.lane.b32.xlu1 %v733_v30, %s1142_s26  ;;  %v731_v31 = vld.sshfl [vmem:[#allocation1 + $0x8] sm:$0xff pattern:$0x73625140]  ;;  %665 = vrot.lane.b32.xlu2 %v659_v25, %s1141_s25  ;;  %s1065_s25 = smul.u32 12, %s1318_s12 }
  0x59   : > { %737 = vrot.lane.b32.xlu0 %v731_v31, %s1142_s26  ;;  %802 = vst [vmem:[#allocation1] ss:$4 sm:$0xff] %v798_v28 }
  0x5a   : > { %s226_s28 = scalar_lea.vmem %s1312_s3, %s1065_s25 }
  0x60   : > { %v807_v32 = vld.sshfl [vmem:[#allocation1 + $0x10] sm:$0xff pattern:$0x73625140]  ;;  %v803_v33 = vld.sshfl [vmem:[#allocation1] sm:$0xff pattern:$0x73625140]  ;;  %735 = vrot.lane.b32.xlu2 %v729_v29, %s1142_s26 }
  0x61   : > { %813 = vrot.lane.b32.xlu0 %v807_v32, %s1143_s27  ;;  %809 = vrot.lane.b32.xlu1 %v803_v33, %s1143_s27  ;;  %v805_v34 = vld.sshfl [vmem:[#allocation1 + $0x8] sm:$0xff pattern:$0x73625140] }
  0x68   : > { %811 = vrot.lane.b32.xlu2 %v805_v34, %s1143_s27  ;;  %v1050_v34 = vld [vmem:[%s1309_s0 + $0x18] sm:$0xf] }
  0x85   : > { %v368_v37 = vpop.permute.xlu2 %367 }
  0x8b   : > { %v245_v38 = vpop.permute.xlu0 %244  ;;  %v243_v39 = vpop.permute.xlu1 %242 }
  0x8c   : > { %v248_v40 = vsel %vm246_vm2, %v243_v39, %v245_v38  ;;  %v261_v41 = vsel %vm253_vm0, %v245_v38, 0 }
  0x8d   : > { %v258_v43 = vsel %vm253_vm0, %v248_v40, 0  ;;  %296 = vmatpush.bf16.msra.mxu2 %v261_v41  ;;  %v370_v45 = vpop.permute.xlu2 %369 }
  0x8e   : > { %283 = vmatpush.bf16.msra.mxu1 %v258_v43  ;;  %v373_v46 = vsel %vm371_vm3, %v368_v37, %v370_v45  ;;  %v384_v53 = vsel %vm253_vm0, %v370_v45, 0  ;;  %v872_v45 = vld [vmem:[%s1310_s1] sm:$0xff] }
  0x8f   : > { %v381_v47 = vsel %vm253_vm0, %v373_v46, 0  ;;  %v1144_v46 = vmov 0  }
  0x90   : > { %1030 = vmatmul.msk.bf16.vlgmr.msra.gmra.mxu2 %vm249_vm1, %v1027_v44  ;;  %406 = vmatpush.bf16.msrb.mxu3 %v381_v47  ;;  %v1054_v47 = vld [vmem:[%s1309_s0 + $0x1c] sm:$0xf] }
  0x91   : > { %1029 = vmatmul.msk.bf16.vlgmr.msra.gmra.mxu1 %vm249_vm1, %v1027_v44  ;;  %1099 = vset.pattern.permute.xlu0 %v1144_v46 }
  0x92   : > { %348 = vmatpush.bf16.msrb.mxu1 %v313_v42  ;;  %875 = vperm.xlu0 %1099, %v872_v45  }
  0x93   : > { %v241_v49 = vpop.permute.xlu0 %240  ;;  %1036 = vmatmul.msk.bf16.vlgmr.msrb.gmra.mxu3 %vm249_vm1, %v1034_v48 }
  0x94   : > { %v247_v50 = vsel %vm246_vm2, %v241_v49, %v243_v39 }
  0x95   : > { %v255_v52 = vsel %vm253_vm0, %v247_v50, 0  ;;  %v440_v57 = vpop.permute.xlu2 %439 }
  0x96   : > { %270 = vmatpush.bf16.msra.mxu0 %v255_v52 }
  0x99   : > { %1028 = vmatmul.msk.bf16.vlgmr.msra.gmra.mxu0 %vm249_vm1, %v1027_v44 }
  0x9a   : > { %335 = vmatpush.bf16.msrb.mxu0 %v311_v51 }
  0x9d   : > { %v366_v54 = vpop.permute.xlu1 %365  ;;  %v516_v2 = vpop.permute.xlu2 %515 }
  0x9e   : > { %419 = vmatpush.bf16.msra.mxu0 %v384_v53  ;;  %v372_v55 = vsel %vm371_vm3, %v366_v54, %v368_v37 }
  0x9f   : > { %v378_v56 = vsel %vm253_vm0, %v372_v55, 0 }
  0xa0   : > { %393 = vmatpush.bf16.msrb.mxu2 %v378_v56 }
  0xa1   : > { %1033 = vmatmul.msk.bf16.vlgmr.msrb.gmra.mxu1 %vm249_vm1, %v229_v36 }
  0xa3   : > { %1035 = vmatmul.msk.bf16.vlgmr.msrb.gmra.mxu2 %vm249_vm1, %v1034_v48 }
  0xa6   : > { %v444_v58 = vpop.permute.xlu1 %443 }
  0xa7   : > { %v458_v59 = vsel %vm253_vm0, %v444_v58, 0  ;;  %v442_v60 = vpop.permute.xlu0 %441 }
  0xa8   : > { %v447_v61 = vsel %vm445_vm4, %v442_v60, %v444_v58  ;;  %v446_v62 = vsel %vm445_vm4, %v440_v57, %v442_v60  ;;  %493 = vmatpush.bf16.msra.mxu3 %v458_v59 }
  0xa9   : > { %1032 = vmatmul.msk.bf16.vlgmr.msrb.gmra.mxu0 %vm249_vm1, %v229_v36  ;;  %v455_v63 = vsel %vm253_vm0, %v447_v61, 0  ;;  %v452_v0 = vsel %vm253_vm0, %v446_v62, 0  ;;  %v324_v49 = vpop.f32.mrf.mxu3 }
  0xaa   : > { %467 = vmatpush.bf16.msra.mxu1 %v452_v0  ;;  %480 = vmatpush.bf16.msra.mxu2 %v455_v63  ;;  %v662_v10 = vpop.permute.xlu2 %661 }
  0xab   : > { %1041 = vmatmul.msk.bf16.vlgmr.msra.gmra.mxu3 %vm249_vm1, %v1038_v1 }
  0xaf   : > { %v518_v3 = vpop.permute.xlu0 %517 }
  0xb0   : > { %v532_v4 = vsel %vm253_vm0, %v518_v3, 0  ;;  %v514_v5 = vpop.permute.xlu1 %513  ;;  %v521_v6 = vsel %vm519_vm5, %v516_v2, %v518_v3 }
  0xb1   : > { %1039 = vmatmul.msk.bf16.vlgmr.msra.gmra.mxu1 %vm249_vm1, %v1038_v1  ;;  %v520_v7 = vsel %vm519_vm5, %v514_v5, %v516_v2  ;;  %v529_v8 = vsel %vm253_vm0, %v521_v6, 0  ;;  %567 = vmatpush.bf16.msrb.mxu2 %v532_v4  ;;  %v326_v50 = vpop.f32.mrf.mxu3 }
  0xb2   : > { %v526_v9 = vsel %vm253_vm0, %v520_v7, 0  ;;  %554 = vmatpush.bf16.msrb.mxu1 %v529_v8  ;;  %v666_v17 = vpop.permute.xlu2 %665 }
  0xb3   : > { %1040 = vmatmul.msk.bf16.vlgmr.msra.gmra.mxu2 %vm249_vm1, %v1038_v1  ;;  %541 = vmatpush.bf16.msrb.mxu0 %v526_v9  ;;  %v680_v27 = vsel %vm253_vm0, %v666_v17, 0 }
  0xb8   : > { %v590_v11 = vpop.permute.xlu1 %589  ;;  %v588_v12 = vpop.permute.xlu0 %587 }
  0xb9   : > { %1037 = vmatmul.msk.bf16.vlgmr.msra.gmra.mxu0 %vm249_vm1, %v1034_v48  ;;  %v594_v13 = vsel %vm593_vm6, %v588_v12, %v590_v11  ;;  %v1058_v48 = vld [vmem:[%s1309_s0 + $0x20] sm:$0xf] }
  0xba   : > { %v600_v14 = vsel %vm253_vm0, %v594_v13, 0  ;;  %v736_v28 = vpop.permute.xlu2 %735 }
  0xbb   : > { %615 = vmatpush.bf16.msrb.mxu3 %v600_v14 }
  0xbe   : > { %1047 = vmatmul.msk.bf16.vlgmr.msrb.gmra.mxu3 %vm249_vm1, %v1046_v15 }
  0xc0   : > { %v592_v18 = vpop.permute.xlu1 %591 }
  0xc1   : > { %1044 = vmatmul.msk.bf16.vlgmr.msrb.gmra.mxu1 %vm249_vm1, %v1042_v16  ;;  %v595_v19 = vsel %vm593_vm6, %v590_v11, %v592_v18  ;;  %v606_v20 = vsel %vm253_vm0, %v592_v18, 0  ;;  %v664_v21 = vpop.permute.xlu0 %663 }
  0xc2   : > { %v603_v22 = vsel %vm253_vm0, %v595_v19, 0  ;;  %v668_v23 = vsel %vm667_vm7, %v662_v10, %v664_v21  ;;  %v669_v24 = vsel %vm667_vm7, %v664_v21, %v666_v17  ;;  %641 = vmatpush.bf16.msra.mxu1 %v606_v20  ;;  %v812_v37 = vpop.permute.xlu2 %811 }
  0xc3   : > { %1045 = vmatmul.msk.bf16.vlgmr.msrb.gmra.mxu2 %vm249_vm1, %v1042_v16  ;;  %v674_v25 = vsel %vm253_vm0, %v668_v23, 0  ;;  %v677_v26 = vsel %vm253_vm0, %v669_v24, 0  ;;  %628 = vmatpush.bf16.msra.mxu0 %v603_v22 }
  0xc4   : > { %689 = vmatpush.bf16.msra.mxu2 %v674_v25  ;;  %702 = vmatpush.bf16.msra.mxu3 %v677_v26 }
  0xc9   : > { %1043 = vmatmul.msk.bf16.vlgmr.msrb.gmra.mxu0 %vm249_vm1, %v1042_v16 }
  0xca   : > { %715 = vmatpush.bf16.msrb.mxu0 %v680_v27  ;;  %v740_v29 = vpop.permute.xlu1 %739 }
  0xcb   : > { %v754_v30 = vsel %vm253_vm0, %v740_v29, 0  ;;  %v738_v31 = vpop.permute.xlu0 %737 }
  0xcc   : > { %v743_v32 = vsel %vm741_vm8, %v738_v31, %v740_v29  ;;  %v742_v33 = vsel %vm741_vm8, %v736_v28, %v738_v31  ;;  %789 = vmatpush.bf16.msrb.mxu3 %v754_v30 }
  0xcd   : > { %v751_v35 = vsel %vm253_vm0, %v743_v32, 0  ;;  %v748_v36 = vsel %vm253_vm0, %v742_v33, 0 }
  0xce   : > { %1052 = vmatmul.msk.bf16.vlgmr.msra.gmra.mxu3 %vm249_vm1, %v1050_v34  ;;  %763 = vmatpush.bf16.msrb.mxu1 %v748_v36 }
  0xcf   : > { %776 = vmatpush.bf16.msrb.mxu2 %v751_v35 }
  0xd1   : > { %1049 = vmatmul.msk.bf16.vlgmr.msra.gmra.mxu1 %vm249_vm1, %v1046_v15 }
  0xd3   : > { %1051 = vmatmul.msk.bf16.vlgmr.msra.gmra.mxu2 %vm249_vm1, %v1050_v34  ;;  %v814_v38 = vpop.permute.xlu0 %813  ;;  %v810_v39 = vpop.permute.xlu1 %809 }
  0xd4   : > { %v828_v40 = vsel %vm253_vm0, %v814_v38, 0  ;;  %v817_v41 = vsel %vm815_vm9, %v812_v37, %v814_v38  ;;  %v816_v42 = vsel %vm815_vm9, %v810_v39, %v812_v37 }
  0xd5   : > { %v825_v43 = vsel %vm253_vm0, %v817_v41, 0  ;;  %863 = vmatpush.bf16.msra.mxu2 %v828_v40  ;;  %v822_v44 = vsel %vm253_vm0, %v816_v42, 0 }
  0xd6   : > { %850 = vmatpush.bf16.msra.mxu1 %v825_v43 }
  0xd9   : > { %1048 = vmatmul.msk.bf16.vlgmr.msra.gmra.mxu0 %vm249_vm1, %v1046_v15 }
  0xda   : > { %837 = vmatpush.bf16.msra.mxu0 %v822_v44 }
  0xde   : > { %1057 = vmatmul.msk.bf16.vlgmr.msrb.gmra.mxu3 %vm249_vm1, %v1054_v47 }
  0xe1   : > { %1055 = vmatmul.msk.bf16.vlgmr.msrb.gmra.mxu1 %vm249_vm1, %v1054_v47 }
  0xe3   : > { %1056 = vmatmul.msk.bf16.vlgmr.msrb.gmra.mxu2 %vm249_vm1, %v1054_v47 }
  0xe9   : > { %1053 = vmatmul.msk.bf16.vlgmr.msrb.gmra.mxu0 %vm249_vm1, %v1050_v34 }
  0xf1   : > { %1060 = vmatmul.msk.bf16.vlgmr.msra.gmra.mxu1 %vm249_vm1, %v1058_v48 }
  0xf3   : > { %1061 = vmatmul.msk.bf16.vlgmr.msra.gmra.mxu2 %vm249_vm1, %v1058_v48 }
  0xf9   : > { %1059 = vmatmul.msk.bf16.vlgmr.msra.gmra.mxu0 %vm249_vm1, %v1058_v48 }
 0x104   : > { %v876_v50 = vpop.permute.xlu0 %875 }
 0x10e   : > { %v285_v51 = vpop.f32.mrf.mxu1 }
 0x113   : > { %v298_v52 = vpop.f32.mrf.mxu2 }
 0x116   : > { %v272_v53 = vpop.f32.mrf.mxu0  ;;  %v287_v54 = vpop.f32.mrf.mxu1 }
 0x117   : > { %v325_v55 = vadd.f32 %v324_v49, %v272_v53  ;;  %v408_v56 = vpop.f32.mrf.mxu3 }
 0x11b   : > { %v300_v57 = vpop.f32.mrf.mxu2 }
 0x11e   : > { %v274_v58 = vpop.f32.mrf.mxu0  ;;  %v350_v59 = vpop.f32.mrf.mxu1 }
 0x11f   : > { %v351_v60 = vadd.f32 %v350_v59, %v298_v52  ;;  %v410_v61 = vpop.f32.mrf.mxu3 }
 0x126   : > { %v395_v62 = vpop.f32.mrf.mxu2  ;;  %v337_v63 = vpop.f32.mrf.mxu0 }
 0x127   : > { %v425_v0 = vadd.f32 %v395_v62, %v325_v55  ;;  %v338_v1 = vadd.f32 %v337_v63, %v285_v51  ;;  %v352_v2 = vpop.f32.mrf.mxu1 }
 0x129   : > { %v426_v3 = vadd.f32 %v408_v56, %v338_v1 }
 0x12e   : > { %v397_v4 = vpop.f32.mrf.mxu2  ;;  %v339_v5 = vpop.f32.mrf.mxu0 }
 0x12f   : > { %v469_v6 = vpop.f32.mrf.mxu1  ;;  %v495_v7 = vpop.f32.mrf.mxu3 }
 0x130   : > { %v499_v40 = vadd.f32 %v469_v6, %v425_v0 }
 0x136   : > { %v482_v8 = vpop.f32.mrf.mxu2  ;;  %v421_v9 = vpop.f32.mrf.mxu0 }
 0x137   : > { %v471_v10 = vpop.f32.mrf.mxu1  ;;  %v497_v11 = vpop.f32.mrf.mxu3  ;;  %v500_v32 = vadd.f32 %v482_v8, %v426_v3  ;;  %v427_v36 = vadd.f32 %v421_v9, %v351_v60 }
 0x139   : > { %v501_v41 = vadd.f32 %v495_v7, %v427_v36 }
 0x13e   : > { %v484_v12 = vpop.f32.mrf.mxu2  ;;  %v423_v13 = vpop.f32.mrf.mxu0 }
 0x13f   : > { %v556_v14 = vpop.f32.mrf.mxu1 }
 0x140   : > { %v574_v33 = vadd.f32 %v556_v14, %v500_v32 }
 0x141   : > { %v617_v15 = vpop.f32.mrf.mxu3 }
 0x146   : > { %v569_v16 = vpop.f32.mrf.mxu2  ;;  %v543_v17 = vpop.f32.mrf.mxu0 }
 0x147   : > { %v558_v18 = vpop.f32.mrf.mxu1  ;;  %v575_v43 = vadd.f32 %v569_v16, %v501_v41  ;;  %v573_v44 = vadd.f32 %v543_v17, %v499_v40 }
 0x149   : > { %v619_v19 = vpop.f32.mrf.mxu3  ;;  %v647_v52 = vadd.f32 %v617_v15, %v573_v44 }
 0x14e   : > { %v571_v20 = vpop.f32.mrf.mxu2  ;;  %v545_v21 = vpop.f32.mrf.mxu0 }
 0x14f   : > { %v643_v22 = vpop.f32.mrf.mxu1 }
 0x150   : > { %v649_v48 = vadd.f32 %v643_v22, %v575_v43 }
 0x151   : > { %v704_v23 = vpop.f32.mrf.mxu3 }
 0x156   : > { %v691_v24 = vpop.f32.mrf.mxu2  ;;  %v630_v25 = vpop.f32.mrf.mxu0 }
 0x157   : > { %v645_v26 = vpop.f32.mrf.mxu1  ;;  %v648_v38 = vadd.f32 %v630_v25, %v574_v33  ;;  %v721_v55 = vadd.f32 %v691_v24, %v647_v52 }
 0x159   : > { %v706_v27 = vpop.f32.mrf.mxu3  ;;  %v722_v42 = vadd.f32 %v704_v23, %v648_v38 }
 0x15e   : > { %v693_v28 = vpop.f32.mrf.mxu2  ;;  %v632_v29 = vpop.f32.mrf.mxu0 }
 0x15f   : > { %v765_v30 = vpop.f32.mrf.mxu1 }
 0x160   : > { %v795_v57 = vadd.f32 %v765_v30, %v721_v55 }
 0x161   : > { %v791_v31 = vpop.f32.mrf.mxu3 }
 0x166   : > { %v778_v34 = vpop.f32.mrf.mxu2  ;;  %v717_v35 = vpop.f32.mrf.mxu0 }
 0x167   : > { %v767_v37 = vpop.f32.mrf.mxu1  ;;  %v796_v45 = vadd.f32 %v778_v34, %v722_v42  ;;  %v723_v53 = vadd.f32 %v717_v35, %v649_v48 }
 0x169   : > { %v793_v39 = vpop.f32.mrf.mxu3  ;;  %v797_v58 = vadd.f32 %v791_v31, %v723_v53 }
 0x16e   : > { %v780_v46 = vpop.f32.mrf.mxu2  ;;  %v719_v47 = vpop.f32.mrf.mxu0 }
 0x16f   : > { %v852_v49 = vpop.f32.mrf.mxu1 }
 0x170   : > { %v870_v51 = vadd.f32 %v852_v49, %v796_v45 }
 0x172   : > { %v879_v54 = vadd.f32 %v876_v50, %v870_v51 }
 0x174   : > { %v882_v56 = vsub.f32 0.0, %v879_v54 }
 0x176   : > { %v886_v59 = vmul.f32 1.442695, %v882_v56  ;;  %v865_v60 = vpop.f32.mrf.mxu2  ;;  %v839_v61 = vpop.f32.mrf.mxu0 }
 0x177   : > { %v871_v62 = vadd.f32 %v865_v60, %v797_v58  ;;  %v869_v63 = vadd.f32 %v839_v61, %v795_v57  ;;  %v854_v0 = vpop.f32.mrf.mxu1 }
 0x178   : > { %1100 = vpow2.f32 %v886_v59 }
 0x179   : > { %v880_v1 = vadd.f32 %v876_v50, %v871_v62  ;;  %v878_v2 = vadd.f32 %v876_v50, %v869_v63 }
 0x17b   : > { %v883_v3 = vsub.f32 0.0, %v880_v1  ;;  %v881_v4 = vsub.f32 0.0, %v878_v2 }
 0x17d   : > { %v888_v5 = vmul.f32 1.442695, %v883_v3  ;;  %v884_v6 = vmul.f32 1.442695, %v881_v4 }
 0x17e   : > { %v841_v7 = vpop.f32.mrf.mxu0  ;;  %v867_v8 = vpop.f32.mrf.mxu2 }
 0x17f   : > { %1102 = vpow2.f32 %v888_v5  ;;  %v1101_v9 = vpop.eup %1100 }
 0x180   : > { %1104 = vpow2.f32 %v884_v6  ;;  %v891_v10 = vadd.f32 1.0, %v1101_v9 }
 0x182   : > { %1106 = vrcp.f32 %v891_v10 }
 0x185   : > { %v1103_v11 = vpop.eup %1102 }
 0x186   : > { %v1105_v12 = vpop.eup %1104  ;;  %v892_v13 = vadd.f32 1.0, %v1103_v11 }
 0x187   : > { %v890_v14 = vadd.f32 1.0, %v1105_v12 }
 0x188   : > { %1108 = vrcp.f32 %v892_v13  ;;  %v1107_v15 = vpop.eup %1106 }
 0x189   : > { %1110 = vrcp.f32 %v890_v14  ;;  %v897_v19 = vmul.f32 %v1107_v15, %v879_v54 }
 0x18e   : > { %v1109_v16 = vpop.eup %1108 }
 0x18f   : > { %v1111_v17 = vpop.eup %1110  ;;  %v898_v18 = vmul.f32 %v1109_v16, %v880_v1 }
 0x190   : > { %v896_v20 = vmul.f32 %v1111_v17, %v878_v2 }
 0x191   : > { %v900_v21 = vpack.c.bf16 %v898_v18, %v898_v18 }
 0x192   : > { %v899_v22 = vpack.c.bf16 %v897_v19, %v896_v20 }
 0x193   : > { %903 = vst.msk [vmem:[%s226_s28 + $0x8] sm:$0xf] %vm902_vm10, %v900_v21 }
 0x194   : > { %901 = vst [vmem:[%s226_s28] sm:$0xff] %v899_v22 }
 0x195 PF: > { %s13_s14 = sadd.s32 1, %s1134_s14   ;;  %s1313_s12 = smov %s1130_s13 }
 0x196   : > { %p10_p5 = scmp.ge.s32.totalorder %s13_s14, 4   ;;  %s1314_s13 = smov %s1316_s15 }
 0x198   :  { %12 = sbr.rel (!%p10_p5) target bundleno = 2 (0x2), region = 76 }

</bundles_post_ra>
